<compile_context>
chip_gen: v7x
topology: tpu7x:2x2x1
jax: 0.10.0
libtpu: 0.0.40
codegen_flags: <defaults>
</compile_context>

<pallas_src>
import numpy as np
import jax
import jax.numpy as jnp
from jax.experimental import pallas as pl
from jax.experimental.pallas import tpu as pltpu


# ----------------------------------------------------------------------------
# Tiling helpers
# ----------------------------------------------------------------------------
def _pick_k_tile(dim, target=512):
    """Feature (contraction) tile: largest 128-multiple divisor of dim <= target,
    or the full dim (a block equal to the full array extent is always legal)."""
    if dim <= target:
        return dim
    for t in (512, 384, 256, 128):
        if dim % t == 0:
            return t
    return dim


# ----------------------------------------------------------------------------
# Kernel 1: U[b] = X[b] @ P^T   (computed once; MXU, f32 accumulation over K)
# ----------------------------------------------------------------------------
def make_xpt_fn(n_bat, bat_n, num_P, dim, tk):
    nk = dim // tk

    def kernel(x_ref, p_ref, u_ref, acc_ref):
        k = pl.program_id(1)

        @pl.when(k == 0)
        def _():
            acc_ref[...] = jnp.zeros_like(acc_ref)

        # Partial U^T = X_b @ P^T (contract the K tile) on the MXU.
        acc_ref[...] += jax.lax.dot_general(
            x_ref[...], p_ref[...], (((1,), (1,)), ((), ())),
            preferred_element_type=jnp.float32)

        @pl.when(k == nk - 1)
        def _():
            u_ref[...] = acc_ref[...]

    grid_spec = pltpu.PrefetchScalarGridSpec(
        num_scalar_prefetch=0,
        grid=(n_bat, nk),                                   # K (reduction) axis last
        in_specs=[
            pl.BlockSpec((None, bat_n, tk), lambda b, k: (b, 0, k)),   # X batches stream
            pl.BlockSpec((num_P, tk), lambda b, k: (0, k)),            # P K-tiles
        ],
        out_specs=pl.BlockSpec((None, bat_n, num_P), lambda b, k: (b, 0, 0)),
        scratch_shapes=[pltpu.VMEM((bat_n, num_P), jnp.float32)],
    )
    return pl.pallas_call(
        kernel,
        out_shape=jax.ShapeDtypeStruct((n_bat, bat_n, num_P), jnp.float32),
        grid_spec=grid_spec,
        compiler_params=pltpu.CompilerParams(
            dimension_semantics=("parallel", "arbitrary"),  # batches split over TCs
            vmem_limit_bytes=64 * 1024 * 1024,
        ),
    )


# ----------------------------------------------------------------------------
# Kernel 2: full Adam gradient-descent loop, fused into ONE kernel.
#   per step:  g    = histogram(argmax_p (U_base_b + h)) / (num_bat * bat_n)
#              grad = g - 1/num_P
#              (h,m,v) = Adam(h,m,v,grad);  h -= mean(h)
#              stop updating once ||grad|| < 0.002   (reference early return)
# ----------------------------------------------------------------------------
def make_run_gd_fn(num_steps, num_bat, bat_n, num_P, lr):
    inv_total = 1.0 / float(num_bat * bat_n)
    inv_num_P = 1.0 / float(num_P)
    eps2 = float(0.002 * 0.002)

    def kernel(u_ref, h_out, h_sc, m_sc, v_sc, g_acc, flag_sc):
        s = pl.program_id(0)   # gradient-descent step
        b = pl.program_id(1)   # MC batch index

        @pl.when(jnp.logical_and(s == 0, b == 0))
        def _():
            h_sc[...] = jnp.zeros_like(h_sc)
            m_sc[...] = jnp.zeros_like(m_sc)
            v_sc[...] = jnp.zeros_like(v_sc)
            flag_sc[...] = jnp.ones_like(flag_sc)      # 1.0 == "still running"

        @pl.when(b == 0)
        def _():
            g_acc[...] = jnp.zeros_like(g_acc)

        # cal_measure: pushed-forward histogram of this MC batch (VPU/XLU only).
        u = u_ref[...] + h_sc[...]                     # broadcast h over samples
        col_ids = jax.lax.broadcasted_iota(jnp.int32, (bat_n, num_P), 1)
        max_val = jnp.max(u, axis=1, keepdims=True)
        # first-occurrence argmax over num_P (lane axis), like torch.max(dim=0)
        ind = jnp.min(jnp.where(u >= max_val, col_ids, num_P),
                      axis=1, keepdims=True)
        g_acc[...] += jnp.sum((col_ids == ind).astype(jnp.float32),
                              axis=0, keepdims=True)

        @pl.when(b == num_bat - 1)
        def _():
            # update_h, gated by the convergence flag (pure VPU arithmetic —
            # once converged, h/m/v stay frozen, matching the early return).
            f = flag_sc[...]                           # (1, 1)
            grad = g_acc[...] * inv_total - inv_num_P
            m_new = 0.9 * m_sc[...] + 0.1 * grad
            v_new = 0.999 * v_sc[...] + 0.001 * (grad * grad)
            h_new = h_sc[...] - lr * (m_new / (jnp.sqrt(v_new) + 1e-8))
            h_new = h_new - jnp.mean(h_new, axis=1, keepdims=True)   # normalize h
            nf = 1.0 - f
            h_sc[...] = f * h_new + nf * h_sc[...]
            m_sc[...] = f * m_new + nf * m_sc[...]
            v_sc[...] = f * v_new + nf * v_sc[...]
            gn2 = jnp.sum(grad * grad, axis=1, keepdims=True)        # ||grad||^2
            flag_sc[...] = f * (gn2 >= eps2).astype(jnp.float32)

        @pl.when(jnp.logical_and(s == num_steps - 1, b == num_bat - 1))
        def _():
            h_out[...] = h_sc[...]

    grid_spec = pltpu.PrefetchScalarGridSpec(
        num_scalar_prefetch=0,
        grid=(num_steps, num_bat),
        in_specs=[
            pl.BlockSpec((None, bat_n, num_P), lambda s, b: (b, 0, 0)),  # U_base streams
        ],
        out_specs=pl.BlockSpec((1, num_P), lambda s, b: (0, 0)),         # h (lane-dense)
        scratch_shapes=[
            pltpu.VMEM((1, num_P), jnp.float32),   # h   (resident across the whole run)
            pltpu.VMEM((1, num_P), jnp.float32),   # adam_m
            pltpu.VMEM((1, num_P), jnp.float32),   # adam_v
            pltpu.VMEM((1, num_P), jnp.float32),   # histogram accumulator
            pltpu.VMEM((1, 1), jnp.float32),       # convergence flag
        ],
    )
    return pl.pallas_call(
        kernel,
        out_shape=jax.ShapeDtypeStruct((1, num_P), jnp.float32),
        grid_spec=grid_spec,
        compiler_params=pltpu.CompilerParams(
            # Both axes carry sequential state (h/m/v, histogram) -> serial.
            dimension_semantics=("arbitrary", "arbitrary"),
            vmem_limit_bytes=64 * 1024 * 1024,
        ),
    )


# ----------------------------------------------------------------------------
# OTBlock forward
# ----------------------------------------------------------------------------
def ot_block_forward(
    x,
    *,
    max_iter=400,
    ot_lr=0.05,
    topk=3,
    angle_threshold=1.4,
    rec_gen_distance=0.75,
    num_gen_x_bat=3,
    seed=0,
):
    """OTBlock.forward: train semi-discrete OT on flattened features, generate
    mixed features via the OT map, return x + (z - x).detach()."""
    N, C, H, W = x.shape
    P = x.reshape(N, -1).astype(jnp.float32)
    num_P = N
    dim = C * H * W
    bat_size_P = num_P            # compute_ot: bat_size_P = num_P
    bat_size_n = bat_size_P       # compute_ot: bat_size_n = bat_size_P
    num_bat = bat_size_P          # train_omt(bat_size_P)
    n_gen_bat = max(num_gen_x_bat, 1)
    n_base = max(num_bat, n_gen_bat)

    tk = _pick_k_tile(dim)
    xpt = make_xpt_fn(n_base, bat_size_n, num_P, dim, tk)
    run_gd = make_run_gd_fn(max_iter + 1, num_bat, bat_size_n, num_P, ot_lr)

    # TODO(synk): torch.quasirandom.SobolEngine has no JAX/Pallas equivalent;
    #             deterministic uniform samples in [-0.5, 0.5] stand in for Sobol.
    # qrng.reset() every step and a fresh SobolEngine in generation mode mean the
    # SAME MC batches are reused everywhere -> one sample tensor, one matmul pass.
    key = jax.random.PRNGKey(seed)
    X_all = jax.random.uniform(key, (n_base, bat_size_n, dim), jnp.float32) - 0.5

    # X @ P^T is constant across the whole gradient descent (only h changes),
    # so it is computed exactly once on the MXU.
    u_all = xpt(X_all, P)                               # (n_base, bat_n, num_P)

    # ---- run_gd: entire Adam loop fused into one kernel, no host syncs ----
    # TODO(synk): run_gd's count_bad / dynamic num_bat doubling and per-step
    #             checkpoint torch.save are not reproduced (static num_bat).
    h = run_gd(u_all)                                   # (1, num_P)

    # ---- gen_P (generation) ----
    numX = num_gen_x_bat * bat_size_P
    bat_size_x = min(numX, bat_size_n)

    @jax.jit
    def gen_topk(u_gen, hh):
        ut = u_gen + hh[None, :, :]        # U^T = X @ P^T + h, lane-dense
        _, idx = jax.lax.top_k(ut, topk)   # top-k target points per sample
        return idx

    # single device->host transfer (small index tensor only)
    idx = np.asarray(gen_topk(u_all[:n_gen_bat], h))

    I_all = np.full((topk, numX), -1, dtype=np.int64)
    for ii in range(n_gen_bat):
        I_ii = idx[ii].T                   # (topk, bat_size_n), like torch.topk dim=0
        I_all[:, ii * bat_size_x:(ii + 1) * bat_size_x] = I_ii[:, :bat_size_x]

    I_all_2 = np.full((2, (topk - 1) * numX), -1, dtype=np.int64)
    for ii in range(topk - 1):
        I_all_2[0, ii * numX:(ii + 1) * numX] = I_all[0, :]
        I_all_2[1, ii * numX:(ii + 1) * numX] = I_all[ii + 1, :]
    I_all = I_all_2

    Pn = np.asarray(P)
    nm = np.concatenate([Pn, np.ones((num_P, 1), np.float32)], axis=1)
    nm = nm / np.linalg.norm(nm, axis=1, keepdims=True)
    cs = np.sum(nm[I_all[0, :], :] * nm[I_all[1, :], :], axis=1)
    cs = np.minimum(np.ones_like(cs), cs)
    theta = np.arccos(cs)

    I_gen = I_all[:, theta <= angle_threshold]
    I_gen = np.sort(I_gen, axis=0)
    _, uni_gen_id = np.unique(I_gen[0, :], return_index=True)
    rng = np.random.RandomState(0)   # deterministic stand-in for np.random.shuffle
    rng.shuffle(uni_gen_id)
    I_gen = I_gen[:, uni_gen_id]
    numGen = min(I_gen.shape[1], bat_size_P)   # max_gen_samples = bat_size_P
    I_gen = I_gen[:, :numGen]

    features = Pn.copy()
    if numGen > 0:
        w = rec_gen_distance
        P_gen = (1.0 - w) * Pn[I_gen[0, :], :] + w * Pn[I_gen[1, :], :]
        features[I_gen[0, :], :] = P_gen

    z = jnp.asarray(features).reshape(N, C, H, W).astype(x.dtype)
    # forward: z = x + (z - x).detach()
    return x + jax.lax.stop_gradient(z - x)


# ----------------------------------------------------------------------------
if __name__ == "__main__":
    key = jax.random.PRNGKey(0)
    # N=8 target points, feature dim = 4*8*8 = 256
    x = jax.random.normal(key, (8, 4, 8, 8), dtype=jnp.float32)

    out = ot_block_forward(x, max_iter=40, seed=0)
    out = jax.block_until_ready(out)

    assert out.shape == x.shape and out.dtype == x.dtype
    assert bool(jnp.all(jnp.isfinite(out)))
    print("KERNEL_OK")
</pallas_src>

<mosaic_0001>
module attributes {stable_mosaic.version = 11 : i64} {
  func.func @kernel(%arg0: i32, %arg1: i32, %arg2: memref<1x8x256xf32, #tpu.memory_space<vmem>>, %arg3: memref<8x256xf32, #tpu.memory_space<vmem>>, %arg4: memref<1x8x8xf32, #tpu.memory_space<vmem>>, %arg5: memref<8x8xf32, #tpu.memory_space<vmem>>) attributes {dimension_semantics = [#tpu.dimension_semantics<parallel>, #tpu.dimension_semantics<arbitrary>], iteration_bounds = array<i64: 8, 1>, scalar_prefetch = 0 : i64, scratch_operands = 1 : i64, tpu.core_type = #tpu.core_type<tc>, window_params = [{transform_indices = @transform_0, window_bounds = array<i64: 1, 8, 256>}, {transform_indices = @transform_1, window_bounds = array<i64: 8, 256>}, {transform_indices = @transform_2, window_bounds = array<i64: 1, 8, 8>}]} {
    %c0_i32 = arith.constant 0 : i32
    %0 = arith.cmpi eq, %arg1, %c0_i32 : i32
    %1 = arith.extui %0 : i1 to i32
    %c0_i32_0 = arith.constant 0 : i32
    %2 = arith.cmpi ne, %1, %c0_i32_0 : i32
    scf.if %2 {
      %cst_11 = arith.constant 0.000000e+00 : f32
      %13 = vector.broadcast %cst_11 : f32 to vector<8x8xf32>
      %c0_12 = arith.constant 0 : index
      %c0_13 = arith.constant 0 : index
      %14 = vector.load %arg5[%c0_12, %c0_13] : memref<8x8xf32, #tpu.memory_space<vmem>>, vector<8x8xf32>
      tpu.vector_store %arg5[%c0_12, %c0_13], %13 {strides = array<i32>} : memref<8x8xf32, #tpu.memory_space<vmem>>, vector<8x8xf32>,
    } else {
    }
    %c0 = arith.constant 0 : index
    %c0_1 = arith.constant 0 : index
    %3 = vector.load %arg5[%c0, %c0_1] : memref<8x8xf32, #tpu.memory_space<vmem>>, vector<8x8xf32>
    %c0_2 = arith.constant 0 : index
    %c0_3 = arith.constant 0 : index
    %c0_4 = arith.constant 0 : index
    %4 = vector.load %arg2[%c0_2, %c0_3, %c0_4] : memref<1x8x256xf32, #tpu.memory_space<vmem>>, vector<1x8x256xf32>
    %5 = vector.shape_cast %4 : vector<1x8x256xf32> to vector<8x256xf32>
    %c0_5 = arith.constant 0 : index
    %c0_6 = arith.constant 0 : index
    %6 = vector.load %arg3[%c0_5, %c0_6] : memref<8x256xf32, #tpu.memory_space<vmem>>, vector<8x256xf32>
    %cst = arith.constant dense<0.000000e+00> : vector<8x8xf32>
    %7 = tpu.matmul %5, %6, %cst {dimension_numbers = #tpu.dot_dimension_numbers<[1], [1], [0], [0], [0, 0, 1, 0], [], []>} : vector<8x256xf32>, vector<8x256xf32>, vector<8x8xf32> -> vector<8x8xf32>
    %8 = arith.addf %3, %7 : vector<8x8xf32>
    %c0_7 = arith.constant 0 : index
    %c0_8 = arith.constant 0 : index
    %9 = vector.load %arg5[%c0_7, %c0_8] : memref<8x8xf32, #tpu.memory_space<vmem>>, vector<8x8xf32>
    tpu.vector_store %arg5[%c0_7, %c0_8], %8 {strides = array<i32>} : memref<8x8xf32, #tpu.memory_space<vmem>>, vector<8x8xf32>,
    %c0_i32_9 = arith.constant 0 : i32
    %10 = arith.cmpi eq, %arg1, %c0_i32_9 : i32
    %11 = arith.extui %10 : i1 to i32
    %c0_i32_10 = arith.constant 0 : i32
    %12 = arith.cmpi ne, %11, %c0_i32_10 : i32
    scf.if %12 {
      %c0_11 = arith.constant 0 : index
      %c0_12 = arith.constant 0 : index
      %13 = vector.load %arg5[%c0_11, %c0_12] : memref<8x8xf32, #tpu.memory_space<vmem>>, vector<8x8xf32>
      %c0_13 = arith.constant 0 : index
      %c0_14 = arith.constant 0 : index
      %c0_15 = arith.constant 0 : index
      %14 = vector.load %arg4[%c0_13, %c0_14, %c0_15] : memref<1x8x8xf32, #tpu.memory_space<vmem>>, vector<1x8x8xf32>
      %15 = vector.shape_cast %14 : vector<1x8x8xf32> to vector<8x8xf32>
      %16 = vector.shape_cast %13 : vector<8x8xf32> to vector<1x8x8xf32>
      tpu.vector_store %arg4[%c0_13, %c0_14, %c0_15], %16 {strides = array<i32>} : memref<1x8x8xf32, #tpu.memory_space<vmem>>, vector<1x8x8xf32>,
    } else {
    }
    return
  }
  func.func @transform_0(%arg0: i32, %arg1: i32) -> (i32, i32, i32) {
    %c0_i32 = arith.constant 0 : i32
    %c0_i32_0 = arith.constant 0 : i32
    return %arg0, %c0_i32, %arg1 : i32, i32, i32
  }
  func.func @transform_1(%arg0: i32, %arg1: i32) -> (i32, i32) {
    %c0_i32 = arith.constant 0 : i32
    %c0_i32_0 = arith.constant 0 : i32
    return %c0_i32, %arg1 : i32, i32
  }
  func.func @transform_2(%arg0: i32, %arg1: i32) -> (i32, i32, i32) {
    %c0_i32 = arith.constant 0 : i32
    %c0_i32_0 = arith.constant 0 : i32
    %c0_i32_1 = arith.constant 0 : i32
    return %arg0, %c0_i32, %c0_i32_0 : i32, i32, i32
  }
}

</mosaic_0001>

<bundles_post_ra>
// kernel: tpu_custom_call.1
= control target key start
LH: loop header
LB: loop body
LE: loop exit
PB: predicated region body
PF: predicated region fallthrough
CT: control target
= control target key end

     0   :  { %7 = vsyncpa [#allocation4], 0  ;;  %s869_s0 = inlined_call_operand.hbm [shape: f32[8,8,256], index: 0, kind: input, shape index: {}]   ;;  %s870_s1 = inlined_call_operand.hbm [shape: f32[8,256], index: 1, kind: input, shape index: {}]   ;;  %s871_s2 = inlined_call_operand.hbm [shape: f32[8,8,8], index: 2, kind: output, shape index: {}]  }
   0x1   :  { %9 = vsyncpa [#allocation4 + $0x1], 0 }
   0x2   :  { %10 = vsyncpa [#allocation7], 0 }
   0x3   :  { %11 = vsyncpa [#allocation5], 0 }
   0x4   :  { %13 = vsyncpa [#allocation5 + $0x1], 0  ;;  %s651_s9 = smov 0   ;;  %s653_s10 = smov 0  }
   0x5   :  { %s655_s11 = smov 0   ;;  %s657_s12 = smov 0  }
   0x6   :  { %s659_s13 = smov 0   ;;  %s661_s14 = smov 0  }
   0x7 LB: > { %s395_s15 = sadd.s32 4294967295, %s630_s14   ;;  %s396_s16 = sadd.s32 4294967294, %s630_s14   ;;  %s630_s14 = sphi %s661_s14, %s19_s14   ;;  %s626_s13 = sphi %s659_s13, %s895_s13   ;;  %s622_s12 = sphi %s657_s12, %s894_s12   ;;  %s618_s11 = sphi %s655_s11, %s893_s11   ;;  %s614_s10 = sphi %s653_s10, %s892_s10   ;;  %s610_s9 = sphi %s651_s9, %s891_s9  }
   0x8   : > { %p53_p0 = scmp.ne.s32.totalorder %s614_s10, %s610_s9  ;;  %p685_p1 = scmp.eq.s32.totalorder %s395_s15, 0 }
   0x9   : > { %p689_p2 = scmp.eq.s32.totalorder %s395_s15, 7  ;;  %p109_p3 = scmp.eq.s32.totalorder %s396_s16, 7 }
   0xa   : > { %s876_s17 = scalar_select %p685_p1, 1, 0 }
   0xb   : > { %s877_s18 = scalar_select %p689_p2, 1, 0 }
   0xc   : > { %p695_p4 = por %p685_p1, %p53_p0  ;;  %p397_p5 = scmp.ge.s32.totalorder %s630_s14, 1 }
   0xd   : > { %p700_p6 = por %p109_p3, %p53_p0  ;;  %p116_p7 = scmp.lt.s32.totalorder %s630_s14, 9 }
   0xe   : > { %s878_s19 = scalar_select %p695_p4, 1, 0 }
   0xf   : > { %s879_s20 = scalar_select %p700_p6, 1, 0 }
  0x10   : > { %p705_p8 = pnand %p397_p5, %p116_p7  ;;  %s632_s22 = smov [#allocation6]  }
  0x11   : > { %s132_s23 = sshll.u32 %s632_s22, 4  ;;  %s31_s25 = sadd.s32 1, %s626_s13  ;;  %s133_s23 = int_to_ptr.vmem [resolvable:$true] %s132_s23 }
  0x12   : > { %s880_s21 = scalar_select %p705_p8, 1, 0 }
  0x13   : > { %p420_p9 = pneg %p705_p8  ;;  %s40_s26 = sadd.s32 1, %s618_s11 }
  0x14   : > { %p719_p11 = scmp.ge.s32.totalorder %s31_s25, 8  ;;  %s486_s30 = scalar_lea.hbm %s870_s1, 256 }
  0x15   : > { %p713_p10 = pnand %p420_p9, %p685_p1  ;;  %p487_p12 = scmp.ne.s32.totalorder %s870_s1, %s486_s30 }
  0x16   : > { %s882_s27 = scalar_select %p719_p11, 1, 0 }
  0x17   : > { %p488_p13 = pneg %p713_p10  ;;  %p493_p5 = scmp.lt.u32.totalorder %s486_s30, %s870_s1 }
  0x19   : > { %p489_p0 = pnand %p488_p13, %p487_p12 }
  0x1b   : > { %p490_p3 = pneg %p489_p0 }
  0x1d   : > { %p495_p7 = pnand %p493_p5, %p490_p3 }
  0x1f   : > { %498 = shalt.err (!%p495_p7)
}
  0x20   : > { %s499_s7 = scalar_lea.vmem %s133_s23, 256  ;;  %p507_p4 = scmp.lt.s32.totalorder %s133_s23, %s133_s23 }
  0x21   : > { %p500_p9 = scmp.ne.s32.totalorder %s133_s23, %s499_s7  ;;  %p508_p8 = scmp.lt.s32.totalorder %s499_s7, %s499_s7 }
  0x23   : > { %p502_p6 = pnand %p500_p9, %p488_p13  ;;  %p509_p2 = por %p508_p8, %p507_p4 }
  0x25   : > { %p503_p1 = pneg %p502_p6 }
  0x27   : > { %p510_p11 = pnand %p509_p2, %p503_p1 }
  0x29   : > { %513 = shalt.err (!%p510_p11)
}
  0x2a   : > { %423 = dma.hbm_to_vmem [thread:$0]  (!%p713_p10), %s870_s1, 256, %s133_s23, [#allocation7]  }
  0x2b   : > { %p883_p4 = scmp.ne.s32.totalorder %s882_s27, 0  ;;  %p47_p1 = scmp.ne.s32.totalorder %s618_s11, %s614_s10 }
  0x2c   : > { %p48_p2 = scmp.eq.s32.totalorder %s630_s14, 0  ;;  %p433_p6 = scmp.lt.s32.totalorder %s630_s14, 8 }
  0x2d   : > { %s897_s25 = smov (%p883_p4, %s31_s25), 0  ;;  %p884_p12 = scmp.ne.s32.totalorder %s877_s18, 0 }
  0x2e   : > { %s35_s16 = ssub.s32 %s626_s13, %s897_s25  ;;  %p49_p11 = por %p48_p2, %p47_p1 }
  0x2f   : > { %p38_p8 = scmp.eq.s32.totalorder %s35_s16, 0  ;;  %p751_p13 = por %p884_p12, %p47_p1 }
  0x30   : > { %s143_s24 = sand.u32 1, %s618_s11   ;;  %s411_s27 = sshll.u32 %s626_s13, 8 }
  0x31   : > { %s759_s28 = scalar_select %p38_p8, %s618_s11, %s40_s26  }
  0x32   : > { %s400_s23 = sshll.u32 %s143_s24, 4  ;;  %s765_s3 = scalar_lea.hbm %s869_s0, %s411_s27 }
  0x33   : > { %s147_s18 = scalar_lea.vmem [#allocation3], %s400_s23  ;;  %p769_p10 = pnand %p433_p6, %p49_p11 }
  0x34   : > { %s157_s4 = sshll.u32 %s147_s18, 4  ;;  %s144_s26 = scalar_lea.sflag [#allocation4], %s143_s24  ;;  %s767_s4 = int_to_ptr.vmem [resolvable:$true] %s157_s4 }
  0x35   : > { %s514_s6 = scalar_lea.hbm %s765_s3, 256  ;;  %p516_p3 = pneg %p769_p10 }
  0x36   : > { %p515_p0 = scmp.ne.s32.totalorder %s765_s3, %s514_s6  ;;  %s519_s15 = scalar_lea.hbm %s869_s0, 2048 }
  0x37   : > { %p520_p9 = scmp.lt.u32.totalorder %s765_s3, %s869_s0  ;;  %p521_p4 = scmp.lt.u32.totalorder %s519_s15, %s514_s6 }
  0x38   : > { %p517_p5 = pnand %p516_p3, %p515_p0  ;;  %p523_p2 = scmp.lt.u32.totalorder %s514_s6, %s765_s3 }
  0x39   : > { %p522_p1 = por %p521_p4, %p520_p9 }
  0x3a   : > { %p518_p7 = pneg %p517_p5 }
  0x3b   : > { %p524_p6 = por %p523_p2, %p522_p1 }
  0x3d   : > { %p525_p8 = pnand %p524_p6, %p518_p7 }
  0x3f   : > { %528 = shalt.err (!%p525_p8)
}
  0x40   : > { %s529_s24 = scalar_lea.vmem %s767_s4, 256  ;;  %s633_s27 = smov [#allocation3]  }
  0x41   : > { %p530_p11 = scmp.ne.s32.totalorder %s767_s4, %s529_s24  ;;  %s534_s29 = sshll.u32 %s633_s27, 4  ;;  %s535_s29 = int_to_ptr.vmem [resolvable:$false] %s534_s29 }
  0x42   : > { %s536_s30 = scalar_lea.vmem %s535_s29, 512  ;;  %p537_p5 = scmp.lt.s32.totalorder %s767_s4, %s535_s29 }
  0x43   : > { %p532_p12 = pnand %p530_p11, %p516_p3  ;;  %p538_p9 = scmp.lt.s32.totalorder %s536_s30, %s529_s24 }
  0x45   : > { %p533_p0 = pneg %p532_p12  ;;  %p539_p4 = por %p538_p9, %p537_p5 }
  0x47   : > { %p540_p1 = pnand %p539_p4, %p533_p0 }
  0x49   : > { %543 = shalt.err (!%p540_p1)
}
  0x4a   : > { %427 = dma.hbm_to_vmem [thread:$0]  (!%p769_p10), %s765_s3, 256, %s767_s4, %s144_s26  }
  0x4b   : > { %p887_p7 = scmp.ne.s32.totalorder %s880_s21, 0 }
  0x4c   : > { %s801_s18 = sand.u32 (!%p887_p7), 1, %s614_s10   ;;  %p888_p3 = scmp.ne.s32.totalorder (!%p887_p7), %s878_s19, 0 }
  0x4d   : > { %166 = sbr.rel (%p887_p7) target bundleno = 329 (0x149), region = 28  ;;  %s404_s6 = sshll.u32 (!%p887_p7), %s801_s18, 4 }
  0x4e   : > { %s169_s7 = scalar_lea.sflag (!%p887_p7), [#allocation4], %s801_s18  ;;  %s172_s8 = scalar_lea.vmem (!%p887_p7), [#allocation3], %s404_s6 }
  0x54   : > { %597 = dma.done.wait (%p888_p3), %s169_s7, 256  }
  0x55   : > { %599 = vsyncadd (%p888_p3), %s169_s7, 4294967040  ;;  %p889_p2 = scmp.ne.s32.totalorder %s876_s17, 0 }
  0x57   : > { %601 = dma.done.wait (%p889_p2), [#allocation7], 256  }
  0x58   : > { %603 = vsyncadd (%p889_p2), [#allocation7], 4294967040  ;;  %vm203_vm0 = vcmask 64512   ;;  %v634_v0 = vmov 0.0   ;;  %v209_v1 = vld [vmem:[#allocation6 + $0x8] sm:$0xff]  ;;  %v208_v2 = vld [vmem:[#allocation6] sm:$0xff] }
  0x59   : > { %204 = vst.msk [vmem:[#allocation2] sm:$0xff] %vm203_vm0, %v634_v0  ;;  %v207_v3 = vld [vmem:[%s172_s8 + $0x8] sm:$0xff]  ;;  %210 = vmatprep.subr.mxu0 %v209_v1  ;;  %v206_v4 = vld [vmem:[%s172_s8] sm:$0xff]  ;;  %s406_s17 = sshll.u32 %s801_s18, 3  ;;  %s408_s19 = sshll.u32 %s622_s12, 7 }
  0x5a   : > { %274 = vmatprep.mubr.f32.mxu0 %v207_v3  ;;  %211 = vmatpush1.xpose.msra.mxu0 %v208_v2  ;;  %s196_s21 = scalar_lea.vmem [#allocation8], %s406_s17  ;;  %s820_s26 = scalar_lea.hbm %s871_s2, %s408_s19 }
  0x5b   : > { %s302_s3 = sshll.u32 %s196_s21, 4  ;;  %s289_s15 = scalar_lea.sflag [#allocation5], %s801_s18  ;;  %s822_s3 = int_to_ptr.vmem [resolvable:$true] %s302_s3 }
  0x5c   : > { %s544_s16 = scalar_lea.vmem %s822_s3, 128  ;;  %s635_s12 = smov [#allocation8]  }
  0x5d   : > { %275 = vmatmul.mubr.f32.vlgmr.msra.gmra.mrb[0].mxu0 %v206_v4  ;;  %p545_p10 = scmp.ne.s32.totalorder %s822_s3, %s544_s16  ;;  %s548_s23 = sshll.u32 %s635_s12, 4  ;;  %s549_s23 = int_to_ptr.vmem [resolvable:$false] %s548_s23 }
  0x5e   : > { %s550_s24 = scalar_lea.vmem %s549_s23, 256  ;;  %p551_p11 = scmp.lt.s32.totalorder %s822_s3, %s549_s23 }
  0x5f   : > { %p546_p6 = pnand %p545_p10, %p751_p13  ;;  %p552_p12 = scmp.lt.s32.totalorder %s550_s24, %s544_s16 }
  0x60   : > { %v205_v5 = vld [vmem:[#allocation2] sm:$0xff] }
  0x61   : > { %p547_p8 = pneg %p546_p6  ;;  %p553_p0 = por %p552_p12, %p551_p11 }
  0x63   : > { %p554_p5 = pnand %p553_p0, %p547_p8 }
 0x130   : > { %v276_v6 = vpop.f32.mrb[0].mxu0 }
 0x131   : > { %v280_v7 = vadd.f32 %v276_v6, %v205_v5  ;;  %v278_v8 = vpop.f32.mrb[1].mxu0 }
 0x133   : > { %282 = vst.msk [vmem:[#allocation2] sm:$0xff] %vm203_vm0, %v280_v7 }
 0x13a   : > { %v286_v9 = vld [vmem:[#allocation2] sm:$0xff] }
 0x13b   : > { %287 = vst.msk [vmem:[%s196_s21] sm:$0xff] %vm203_vm0, %v286_v9 }
 0x13c   : > { %557 = shalt.err (!%p554_p5)
}
 0x13d   : > { %s558_s27 = scalar_lea.hbm %s820_s26, 128  ;;  %s562_s18 = scalar_lea.hbm %s871_s2, 1024 }
 0x13e   : > { %p559_p9 = scmp.ne.s32.totalorder %s820_s26, %s558_s27  ;;  %p563_p7 = scmp.lt.u32.totalorder %s820_s26, %s871_s2 }
 0x13f   : > { %p564_p3 = scmp.lt.u32.totalorder %s562_s18, %s558_s27  ;;  %p566_p10 = scmp.lt.u32.totalorder %s558_s27, %s820_s26 }
 0x140   : > { %p560_p4 = pnand %p559_p9, %p751_p13 }
 0x141   : > { %p565_p2 = por %p564_p3, %p563_p7 }
 0x142   : > { %p561_p1 = pneg %p560_p4 }
 0x143   : > { %p567_p6 = por %p566_p10, %p565_p2 }
 0x145   : > { %p568_p8 = pnand %p567_p6, %p561_p1 }
 0x147   : > { %571 = shalt.err (!%p568_p8)
}
 0x148   : > { %418 = dma.vmem_to_hbm [thread:$0]  (%p751_p13), %s822_s3, 128, %s820_s26, %s289_s15  }
 0x149 PF: > { %p435_p11 = scmp.ge.s32.totalorder %s630_s14, 2  ;;  %s314_s8 = sand.u32 1, %s610_s9  }
 0x14a   : > { %p890_p12 = scmp.ne.s32.totalorder %s879_s20, 0  ;;  %s315_s17 = scalar_lea.sflag [#allocation5], %s314_s8 }
 0x14c   : > { %p429_p0 = pnand %p435_p11, %p890_p12 }
 0x14e   : > { %605 = dma.done.wait (!%p429_p0), %s315_s17, 128  }
 0x14f   : > { %607 = vsyncadd (!%p429_p0), %s315_s17, 4294967168  ;;  %s19_s14 = sadd.s32 1, %s630_s14   ;;  %s891_s9 = smov %s614_s10 }
 0x150   : > { %p16_p5 = scmp.ge.s32.totalorder %s19_s14, 10   ;;  %s892_s10 = smov %s618_s11 }
 0x151   : > { %s893_s11 = smov %s759_s28  ;;  %s894_s12 = smov %s626_s13 }
 0x152   : > { %s895_s13 = smov %s897_s25  ;;  %18 = sbr.rel (!%p16_p5) target bundleno = 7 (0x7), region = 86 }
 0x159   :  { %320 = vsyncpa [#allocation4], 1 }
 0x15a   :  { %322 = vsyncpa [#allocation4 + $0x1], 1 }
 0x15b   :  { %323 = vsyncpa [#allocation7], 1 }
 0x15c   :  { %324 = vsyncpa [#allocation5], 1 }
 0x15d   :  { %326 = vsyncpa [#allocation5 + $0x1], 1 }

</bundles_post_ra>
